<compile_context>
chip_gen: v6e
topology: v6e:2x2x1
jax: 0.10.0
libtpu: 0.0.40
codegen_flags: <defaults>
</compile_context>

<pallas_src>
import jax
import jax.numpy as jnp
import numpy as np
from jax.experimental import pallas as pl
from jax.experimental.pallas import tpu as pltpu


# ---------------------------------------------------------------------------
# Small helpers
# ---------------------------------------------------------------------------
def _round_up(a, m):
    return -(-a // m) * m


def _is_v7x():
    try:
        return "v7" in jax.devices()[0].device_kind.lower()
    except Exception:
        return False


def _vmem_limit(bytes_needed):
    # v7x has 64 MiB VMEM per TensorCore (vs 128 MiB on v5e/v6e): cap lower.
    cap = (40 << 20) if _is_v7x() else (96 << 20)
    return int(min(cap, max(int(bytes_needed), 16 << 20)))


# ---------------------------------------------------------------------------
# Parameter setup (deterministic, eval-mode BN folded into conv weight/bias)
# ---------------------------------------------------------------------------
def _fold_bn(w, b, gamma, beta, mean, var, eps=1e-5):
    """Fold eval-mode BatchNorm1d into a k=1 Conv1d.

    Conv (channels-first columns): y = W x + b with W: [Cout, Cin].
    BN eval: z = (y - mean) * gamma / sqrt(var + eps) + beta.
    Returns W_f: [Cout, Cin], b_f: [Cout] so that z = W_f x + b_f.
    """
    scale = gamma / jnp.sqrt(var + eps)
    w_f = w * scale[:, None]
    b_f = (b - mean) * scale + beta
    return w_f.astype(jnp.float32), b_f.astype(jnp.float32)


def init_conv_bn_relu_params(key, in_channels, out_channels):
    k1, k2, k3, k4, k5, k6 = jax.random.split(key, 6)
    w = 0.2 * jax.random.normal(k1, (out_channels, in_channels), jnp.float32)
    b = 0.1 * jax.random.normal(k2, (out_channels,), jnp.float32)
    gamma = 1.0 + 0.1 * jax.random.normal(k3, (out_channels,), jnp.float32)
    beta = 0.1 * jax.random.normal(k4, (out_channels,), jnp.float32)
    mean = 0.1 * jax.random.normal(k5, (out_channels,), jnp.float32)
    var = 1.0 + 0.1 * jnp.abs(jax.random.normal(k6, (out_channels,), jnp.float32))
    return _fold_bn(w, b, gamma, beta, mean, var)


def init_pre_extraction_params(key, channels, out_channels, blocks=1, use_xyz=True):
    in_ch = 3 + 2 * channels if use_xyz else 2 * channels
    C = out_channels
    keys = jax.random.split(key, 1 + 2 * blocks)
    wt, bt = init_conv_bn_relu_params(keys[0], in_ch, C)      # transfer
    w1s, b1s, w2s, b2s = [], [], [], []
    for blk in range(blocks):                                  # ConvBNReLURes1D
        w1, b1 = init_conv_bn_relu_params(keys[1 + 2 * blk], C, C)
        w2, b2 = init_conv_bn_relu_params(keys[2 + 2 * blk], C, C)
        w1s.append(w1); b1s.append(b1)
        w2s.append(w2); b2s.append(b2)
    return (wt, bt[:, None],
            jnp.stack(w1s), jnp.stack(b1s)[:, :, None],
            jnp.stack(w2s), jnp.stack(b2s)[:, :, None])


# ---------------------------------------------------------------------------
# Kernel 1: ConvBNReLU1D (the spec module) -- x [B, Cin, N] -> [B, Cout, N]
# ---------------------------------------------------------------------------
def _conv_bn_relu_1d_kernel(x_ref, w_ref, b_ref, o_ref):
    # x_ref: (1, Cin, tn) bf16 ; w_ref: (Cout, Cin) bf16 ; b_ref: (Cout, 1) f32
    x = x_ref[0]                                                   # (Cin, tn)
    y = jnp.dot(w_ref[...], x, preferred_element_type=jnp.float32)  # (Cout, tn)
    o_ref[0] = jnp.maximum(y + b_ref[...], 0.0).astype(o_ref.dtype)


def conv_bn_relu_1d_forward(x, w_f, b_f, *, tn=None, target_lanes=32768):
    """ConvBNReLU1D.forward: ReLU(BN(Conv1d_k1(x))), x: [B, Cin, N]."""
    B, Cin, N = x.shape
    Cout = w_f.shape[0]

    if tn is None:
        tn = target_lanes
    tn = min(_round_up(max(int(tn), 1), 128), _round_up(N, 128), 65536)

    n_tiles = pl.cdiv(N, tn)
    if n_tiles > 1 and n_tiles % 2 and _is_v7x():
        n_tiles += 1                     # keep both v7x TCs busy; skip on v5e/v6e
    N_pad = n_tiles * tn

    xb = x.astype(jnp.bfloat16)
    if N_pad != N:
        xb = jnp.pad(xb, ((0, 0), (0, 0), (0, N_pad - N)))

    # padded VMEM footprint (double-buffered in/out blocks + weights + slack)
    needed = (2 * _round_up(Cin, 16) * tn * 2
              + 2 * _round_up(Cout, 8) * tn * 4
              + _round_up(Cout, 16) * _round_up(Cin, 128) * 2
              + _round_up(Cout, 8) * 128 * 4
              + (4 << 20))

    out = pl.pallas_call(
        _conv_bn_relu_1d_kernel,
        out_shape=jax.ShapeDtypeStruct((B, Cout, N_pad), jnp.float32),
        grid_spec=pltpu.PrefetchScalarGridSpec(
            num_scalar_prefetch=0,
            grid=(B, n_tiles),
            in_specs=[
                pl.BlockSpec((1, Cin, tn), lambda bi, ni: (bi, 0, ni)),
                pl.BlockSpec((Cout, Cin), lambda bi, ni: (0, 0)),
                pl.BlockSpec((Cout, 1), lambda bi, ni: (0, 0)),
            ],
            out_specs=pl.BlockSpec((1, Cout, tn), lambda bi, ni: (bi, 0, ni)),
        ),
        compiler_params=pltpu.CompilerParams(
            dimension_semantics=("parallel", "parallel"),
            vmem_limit_bytes=_vmem_limit(needed)),
        cost_estimate=pl.CostEstimate(
            flops=int(2 * B * N_pad * Cout * Cin), transcendentals=0,
            bytes_accessed=int(B * N_pad * (Cin * 2 + Cout * 4) + w_f.size * 2)),
    )(xb, w_f.astype(jnp.bfloat16), b_f.reshape(Cout, 1).astype(jnp.float32))
    return out[:, :, :N]


# ---------------------------------------------------------------------------
# Kernel 2: PreExtraction-style composition (previous kernel's scope)
#   transfer ConvBNReLU1D(d->C) + ConvBNReLURes1D blocks + max over s
# ---------------------------------------------------------------------------
def _pre_extraction_kernel(x_ref, wt_ref, bt_ref, w1_ref, b1_ref, w2_ref,
                           b2_ref, o_ref):
    p = pl.program_id(1)                 # position index (innermost grid axis)
    num_blocks = w1_ref.shape[0]

    x = x_ref[0]                                                 # (d, tg) bf16

    # transfer: ConvBNReLU1D (k=1 conv == channel matmul, BN folded) + ReLU
    h = jnp.dot(wt_ref[...], x, preferred_element_type=jnp.float32)  # (C, tg)
    h = jnp.maximum(h + bt_ref[...], 0.0)

    # ConvBNReLURes1D blocks (static unroll); bf16 matmul operands, f32 else.
    for blk in range(num_blocks):
        h1 = jnp.dot(w1_ref[blk], h.astype(jnp.bfloat16),
                     preferred_element_type=jnp.float32)
        h1 = jnp.maximum(h1 + b1_ref[blk], 0.0)
        h2 = jnp.dot(w2_ref[blk], h1.astype(jnp.bfloat16),
                     preferred_element_type=jnp.float32)
        h = jnp.maximum(h2 + b2_ref[blk] + h, 0.0)

    # adaptive_max_pool1d(., 1): running max over the s grid steps; the output
    # block is resident across the innermost axis (written back once per gi).
    @pl.when(p == 0)
    def _():
        o_ref[...] = h

    @pl.when(p > 0)
    def _():
        o_ref[...] = jnp.maximum(o_ref[...], h)


def pre_extraction_forward(x, params, *, tg=None, target_lanes=16384):
    """x: [b, n, s, d] -> [b, C, n] (ConvBNReLU1D transfer + blocks + max pool)."""
    b, n, s, d = x.shape
    G = b * n
    wt, bt, w1s, b1s, w2s, b2s = params
    C = wt.shape[0]
    num_blocks = w1s.shape[0]

    # groups-per-tile on the lane axis; big tiles are cheap after the flip
    if tg is None:
        tg = target_lanes
    tg = min(_round_up(max(int(tg), 1), 128), _round_up(G, 128), 65536)

    g_tiles = pl.cdiv(G, tg)
    if g_tiles > 1 and g_tiles % 2 and _is_v7x():
        g_tiles += 1                     # dummy tile only where megacore gains
    G_pad = g_tiles * tg

    # channels on sublanes, groups on lanes, positions outermost: (s, d, G_pad)
    x2 = x.reshape(G, s, d).astype(jnp.bfloat16)
    if G_pad != G:
        x2 = jnp.pad(x2, ((0, G_pad - G), (0, 0), (0, 0)))
    xt = jnp.transpose(x2, (1, 2, 0))

    wt_b = wt.astype(jnp.bfloat16)
    w1_b = w1s.astype(jnp.bfloat16)
    w2_b = w2s.astype(jnp.bfloat16)

    # padded VMEM footprint (NOT the advisory logical bytes of CostEstimate)
    needed = (2 * _round_up(d, 16) * tg * 2               # x block, dbl-buffered
              + 2 * _round_up(C, 8) * tg * 4              # resident out block
              + _round_up(C, 16) * 128 * 2                # transfer weight
              + 2 * num_blocks * _round_up(C, 16) * _round_up(C, 128) * 2
              + (1 + 2 * num_blocks) * _round_up(C, 8) * 128 * 4
              + (4 << 20))

    flops = 2 * G_pad * s * C * (d + 2 * num_blocks * C)
    bytes_accessed = (G_pad * s * d * 2 + G_pad * C * 4
                      + (wt.size + w1s.size + w2s.size) * 2
                      + (bt.size + b1s.size + b2s.size) * 4)

    out = pl.pallas_call(
        _pre_extraction_kernel,
        out_shape=jax.ShapeDtypeStruct((C, G_pad), jnp.float32),
        grid_spec=pltpu.PrefetchScalarGridSpec(
            num_scalar_prefetch=0,
            grid=(g_tiles, s),           # s innermost: output-resident max
            in_specs=[
                pl.BlockSpec((1, d, tg), lambda gi, p: (p, 0, gi)),        # x
                pl.BlockSpec((C, d), lambda gi, p: (0, 0)),                # Wt
                pl.BlockSpec((C, 1), lambda gi, p: (0, 0)),                # bt
                pl.BlockSpec((num_blocks, C, C), lambda gi, p: (0, 0, 0)),  # W1
                pl.BlockSpec((num_blocks, C, 1), lambda gi, p: (0, 0, 0)),  # b1
                pl.BlockSpec((num_blocks, C, C), lambda gi, p: (0, 0, 0)),  # W2
                pl.BlockSpec((num_blocks, C, 1), lambda gi, p: (0, 0, 0)),  # b2
            ],
            out_specs=pl.BlockSpec((C, tg), lambda gi, p: (0, gi)),
        ),
        compiler_params=pltpu.CompilerParams(
            dimension_semantics=("parallel", "arbitrary"),
            vmem_limit_bytes=_vmem_limit(needed)),
        cost_estimate=pl.CostEstimate(flops=int(flops), transcendentals=0,
                                      bytes_accessed=int(bytes_accessed)),
    )(xt, wt_b, bt, w1_b, b1s, w2_b, b2s)

    out = out[:, :G].reshape(C, b, n)
    return jnp.transpose(out, (1, 0, 2))                       # [b, C, n]


# ---------------------------------------------------------------------------
# Pure-JAX references (for correctness checks)
# ---------------------------------------------------------------------------
def ref_conv_bn_relu_1d(x, w_f, b_f, *, compute_dtype=jnp.float32):
    y = jnp.einsum("oc,bcn->bon", w_f.astype(compute_dtype),
                   x.astype(compute_dtype),
                   preferred_element_type=jnp.float32)
    return jnp.maximum(y + b_f[None, :, None], 0.0)


def ref_pre_extraction(x, params, *, compute_dtype=jnp.float32):
    b, n, s, d = x.shape
    wt, bt, w1s, b1s, w2s, b2s = params
    cd = compute_dtype

    def mm(w, a):   # w: [Co, Ci], a: [g, s, Ci] -> [g, s, Co]
        return jnp.einsum("oc,gsc->gso", w.astype(cd), a.astype(cd),
                          preferred_element_type=jnp.float32)

    h = x.reshape(b * n, s, d).astype(jnp.float32)
    h = jnp.maximum(mm(wt, h) + bt[:, 0], 0.0)
    for blk in range(w1s.shape[0]):
        h1 = jnp.maximum(mm(w1s[blk], h) + b1s[blk][:, 0], 0.0)
        h = jnp.maximum(mm(w2s[blk], h1) + b2s[blk][:, 0] + h, 0.0)
    out = jnp.max(h, axis=1)                                    # [G, C]
    return out.reshape(b, n, -1).transpose(0, 2, 1)             # [b, C, n]


# ---------------------------------------------------------------------------
if __name__ == "__main__":
    key = jax.random.PRNGKey(0)
    k1, k2, k3, k4, k5 = jax.random.split(key, 5)

    # ---- ConvBNReLU1D (the spec module): x [B, Cin, N] -> [B, Cout, N] -----
    B, Cin, Cout, N = 2, 11, 32, 200
    xc = jax.random.normal(k1, (B, Cin, N), jnp.float32)
    w_f, b_f = init_conv_bn_relu_params(k2, Cin, Cout)
    out_c = jax.block_until_ready(conv_bn_relu_1d_forward(xc, w_f, b_f))
    assert out_c.shape == (B, Cout, N)
    np.testing.assert_allclose(
        np.asarray(out_c),
        np.asarray(ref_conv_bn_relu_1d(xc, w_f, b_f, compute_dtype=jnp.bfloat16)),
        rtol=1e-3, atol=1e-3)
    np.testing.assert_allclose(
        np.asarray(out_c), np.asarray(ref_conv_bn_relu_1d(xc, w_f, b_f)),
        rtol=1e-1, atol=1e-1)

    # ---- PreExtraction composition (previous kernel's scope) ---------------
    b, n, s, channels, out_channels, blocks = 2, 40, 16, 4, 32, 2
    d = 3 + 2 * channels
    x = jax.random.normal(k3, (b, n, s, d), jnp.float32)
    params = init_pre_extraction_params(k4, channels, out_channels,
                                        blocks=blocks, use_xyz=True)

    out1 = jax.block_until_ready(pre_extraction_forward(x, params))
    assert out1.shape == (b, out_channels, n)
    np.testing.assert_allclose(
        np.asarray(out1),
        np.asarray(ref_pre_extraction(x, params, compute_dtype=jnp.bfloat16)),
        rtol=1e-3, atol=1e-3)
    np.testing.assert_allclose(
        np.asarray(out1), np.asarray(ref_pre_extraction(x, params)),
        rtol=1e-1, atol=1e-1)

    # forced small lane tile: exercises multi-tile grid + group padding path
    n2 = 200
    x_mt = jax.random.normal(k5, (b, n2, s, d), jnp.float32)
    out2 = jax.block_until_ready(pre_extraction_forward(x_mt, params, tg=128))
    assert out2.shape == (b, out_channels, n2)
    np.testing.assert_allclose(
        np.asarray(out2),
        np.asarray(ref_pre_extraction(x_mt, params, compute_dtype=jnp.bfloat16)),
        rtol=1e-3, atol=1e-3)

    print("KERNEL_OK")
</pallas_src>

<mosaic_0001>
module attributes {stable_mosaic.version = 11 : i64} {
  func.func @_conv_bn_relu_1d_kernel(%arg0: i32, %arg1: i32, %arg2: memref<1x11x256xbf16, #tpu.memory_space<vmem>>, %arg3: memref<32x11xbf16, #tpu.memory_space<vmem>>, %arg4: memref<32x1xf32, #tpu.memory_space<vmem>>, %arg5: memref<1x32x256xf32, #tpu.memory_space<vmem>>) attributes {dimension_semantics = [#tpu.dimension_semantics<parallel>, #tpu.dimension_semantics<parallel>], iteration_bounds = array<i64: 2, 1>, scalar_prefetch = 0 : i64, scratch_operands = 0 : i64, tpu.core_type = #tpu.core_type<tc>, window_params = [{transform_indices = @transform_0, window_bounds = array<i64: 1, 11, 256>}, {pipeline_mode = #tpu.pipeline_mode<synchronous>, transform_indices = @transform_1, window_bounds = array<i64: 32, 11>}, {pipeline_mode = #tpu.pipeline_mode<synchronous>, transform_indices = @transform_2, window_bounds = array<i64: 32, 1>}, {transform_indices = @transform_3, window_bounds = array<i64: 1, 32, 256>}]} {
    %c0 = arith.constant 0 : index
    %c0_0 = arith.constant 0 : index
    %c0_1 = arith.constant 0 : index
    %0 = vector.load %arg2[%c0, %c0_0, %c0_1] : memref<1x11x256xbf16, #tpu.memory_space<vmem>>, vector<1x11x256xbf16>
    %1 = vector.shape_cast %0 : vector<1x11x256xbf16> to vector<11x256xbf16>
    %c0_2 = arith.constant 0 : index
    %c0_3 = arith.constant 0 : index
    %2 = vector.load %arg3[%c0_2, %c0_3] : memref<32x11xbf16, #tpu.memory_space<vmem>>, vector<32x11xbf16>
    %cst = arith.constant dense<0.000000e+00> : vector<32x256xf32>
    %3 = tpu.matmul %2, %1, %cst {dimension_numbers = #tpu.dot_dimension_numbers<[1], [0], [0], [1], [0, 0, 1, 1], [], []>} : vector<32x11xbf16>, vector<11x256xbf16>, vector<32x256xf32> -> vector<32x256xf32>
    %c0_4 = arith.constant 0 : index
    %c0_5 = arith.constant 0 : index
    %4 = vector.load %arg4[%c0_4, %c0_5] : memref<32x1xf32, #tpu.memory_space<vmem>>, vector<32x1xf32>
    %5 = vector.broadcast %4 : vector<32x1xf32> to vector<32x256xf32>
    %6 = arith.addf %3, %5 : vector<32x256xf32>
    %cst_6 = arith.constant 0.000000e+00 : f32
    %7 = vector.broadcast %cst_6 : f32 to vector<32x256xf32>
    %8 = arith.maximumf %6, %7 : vector<32x256xf32>
    %c0_7 = arith.constant 0 : index
    %c0_8 = arith.constant 0 : index
    %c0_9 = arith.constant 0 : index
    %9 = vector.load %arg5[%c0_7, %c0_8, %c0_9] : memref<1x32x256xf32, #tpu.memory_space<vmem>>, vector<1x32x256xf32>
    %10 = vector.shape_cast %9 : vector<1x32x256xf32> to vector<32x256xf32>
    %11 = vector.shape_cast %8 : vector<32x256xf32> to vector<1x32x256xf32>
    tpu.vector_store %arg5[%c0_7, %c0_8, %c0_9], %11 {strides = array<i32>} : memref<1x32x256xf32, #tpu.memory_space<vmem>>, vector<1x32x256xf32>,
    return
  }
  func.func @transform_0(%arg0: i32, %arg1: i32) -> (i32, i32, i32) {
    %c0_i32 = arith.constant 0 : i32
    %c0_i32_0 = arith.constant 0 : i32
    return %arg0, %c0_i32, %arg1 : i32, i32, i32
  }
  func.func @transform_1(%arg0: i32, %arg1: i32) -> (i32, i32) {
    %c0_i32 = arith.constant 0 : i32
    %c0_i32_0 = arith.constant 0 : i32
    %c0_i32_1 = arith.constant 0 : i32
    return %c0_i32, %c0_i32_0 : i32, i32
  }
  func.func @transform_2(%arg0: i32, %arg1: i32) -> (i32, i32) {
    %c0_i32 = arith.constant 0 : i32
    %c0_i32_0 = arith.constant 0 : i32
    %c0_i32_1 = arith.constant 0 : i32
    return %c0_i32, %c0_i32_0 : i32, i32
  }
  func.func @transform_3(%arg0: i32, %arg1: i32) -> (i32, i32, i32) {
    %c0_i32 = arith.constant 0 : i32
    %c0_i32_0 = arith.constant 0 : i32
    return %arg0, %c0_i32, %arg1 : i32, i32, i32
  }
}

</mosaic_0001>

<bundles_post_ra>
// kernel: tpu_custom_call.1
= control target key start
LH: loop header
LB: loop body
LE: loop exit
PB: predicated region body
PF: predicated region fallthrough
CT: control target
= control target key end

     0   :  { %8 = vsyncpa [#allocation3], 0  ;;  %s758_s0 = inlined_call_operand.vmem [shape: bf16[2,11,256], index: 0, kind: input, shape index: {}]   ;;  %s759_s1 = inlined_call_operand.vmem [shape: bf16[32,11], index: 1, kind: input, shape index: {}]   ;;  %s760_s2 = inlined_call_operand.vmem [shape: f32[32,1], index: 2, kind: input, shape index: {}]   ;;  %s761_s3 = inlined_call_operand.hbm [shape: f32[2,32,256], index: 3, kind: output, shape index: {}]  }
   0x1   :  { %10 = vsyncpa [#allocation3 + $0x1], 0  ;;  %s622_s12 = smov 0   ;;  %s624_s13 = smov 0  }
   0x2   :  { %s626_s14 = smov 0   ;;  %s628_s15 = smov 0  }
   0x3   :  { %s630_s16 = smov 0   ;;  %s632_s17 = smov 0  }
   0x4 LB: > { %s430_s18 = sadd.s32 4294967295, %s595_s17   ;;  %s431_s19 = sadd.s32 4294967294, %s595_s17   ;;  %s595_s17 = sphi %s632_s17, %s16_s17   ;;  %s591_s16 = sphi %s630_s16, %s768_s16   ;;  %s587_s15 = sphi %s628_s15, %s767_s15   ;;  %s583_s14 = sphi %s626_s14, %s766_s14   ;;  %s579_s13 = sphi %s624_s13, %s765_s13   ;;  %s575_s12 = sphi %s622_s12, %s764_s12  }
   0x5   : > { %s28_s20 = sadd.s32 1, %s591_s16  ;;  %s107_s21 = sadd.s32 1, %s583_s14 }
   0x6   : > { %p30_p0 = scmp.ge.s32.totalorder %s28_s20, 2  ;;  %p117_p1 = scmp.ne.s32.totalorder %s583_s14, %s579_s13 }
   0x7   : > { %p118_p2 = scmp.eq.s32.totalorder %s430_s18, 1  ;;  %p123_p3 = scmp.ne.s32.totalorder %s579_s13, %s575_s12 }
   0x8   : > { %s770_s20 = smov (%p30_p0, %s28_s20), 0  ;;  %p124_p5 = scmp.eq.s32.totalorder %s431_s19, 1 }
   0x9   : > { %p662_p4 = por %p118_p2, %p117_p1  ;;  %s102_s23 = ssub.s32 %s591_s16, %s770_s20 }
   0xa   : > { %p434_p6 = scmp.ge.s32.totalorder %s595_s17, 1  ;;  %p105_p7 = scmp.eq.s32.totalorder %s102_s23, 0 }
   0xb   : > { %p669_p8 = por %p124_p5, %p123_p3  ;;  %p161_p9 = scmp.lt.s32.totalorder %s595_s17, 3 }
   0xc   : > { %s675_s25 = scalar_select %p105_p7, %s583_s14, %s107_s21  }
   0xd   : > { %p162_p10 = pnand %p434_p6, %p161_p9 }
   0xe   : > { %p190_p11 = scmp.lt.s32.totalorder (!%p162_p10), %s587_s15, 1  ;;  %s450_s29 = sshll.u32 (!%p162_p10), %s587_s15, 10 }
   0xf   : > { %165 = sbr.rel (%p162_p10) target bundleno = 249 (0xf9), region = 32  ;;  %s707_s6 = scalar_lea.hbm (!%p162_p10), %s761_s3, %s450_s29 }
  0x10   : > { %s599_s8 = smov (!%p162_p10), [#allocation2]  }
  0x11   : > { %s523_s9 = sshll.u32 (!%p162_p10), %s599_s8, 4  ;;  %s524_s9 = int_to_ptr.vmem [resolvable:$false] %s523_s9 }
  0x12   : > { %s525_s10 = scalar_lea.vmem (!%p162_p10), %s524_s9, 2048 }
  0x14   : > { %vm256_vm0 = vcmask 1044480   ;;  %vm257_vm1 = vcmask 1045504   ;;  %v597_v0 = vmov 0   ;;  %s191_s26 = scalar_select %p190_p11, %s587_s15, 1  ;;  %v598_v1 = vmov 65535   ;;  %v209_v3 = vld [vmem:[%s760_s2 + $0x10] sm:$0xff] }
  0x15   : > { %298 = vmatprep.mubr.bf16.mxu0 %v597_v0  ;;  %308 = vmatprep.mubr.bf16.mxu1 %v597_v0  ;;  %v258_v2 = vsel %vm256_vm0, 4294967295, %v598_v1  ;;  %v207_v4 = vld [vmem:[%s760_s2] sm:$0xff]  ;;  %v210_v6 = vld [vmem:[%s760_s2 + $0x18] sm:$0xff]  ;;  %v208_v7 = vld [vmem:[%s760_s2 + $0x8] sm:$0xff]  ;;  %vm249_vm2 = vcmask 89088  }
  0x16   : > { %513 = vset.pattern.permute.xlu1 %v597_v0  ;;  %512 = vset.pattern.permute.xlu0 %v597_v0  ;;  %s449_s4 = sshll.u32 %s191_s26, 4  ;;  %v259_v5 = vsel %vm257_vm1, %v258_v2, 0  ;;  %v517_v12 = vld [vmem:[%s759_s1] sm:$0xff]   ;;  %v518_v13 = vld [vmem:[%s759_s1 + $0x8] sm:$0xff]   ;;  %s186_s26 = sand.u32 1, %s579_s13  }
  0x17   : > { %223 = vperm.xlu1 %513, %v209_v3   ;;  %213 = vperm.xlu0 %512, %v207_v4   ;;  %s197_s7 = scalar_lea.vmem %s758_s0, %s449_s4  ;;  %s435_s27 = sshll.u32 %s186_s26, 6 }
  0x18   : > { %v514_v8 = vld [vmem:[%s197_s7 + $0x4] ss:$8 sps:$4 sm:$0x3f]   ;;  %v516_v9 = vld [vmem:[%s197_s7] ss:$8 sps:$4 sm:$0x3f]  }
  0x19   : > { %v264_v10 = vand.u32 %v514_v8, %v259_v5  ;;  %v261_v11 = vand.u32 %v516_v9, %v259_v5  ;;  %s188_s28 = scalar_lea.vmem [#allocation2], %s435_s27  ;;  %s713_s15 = scalar_lea.sflag [#allocation3], %s186_s26 }
  0x1a   : > { %s351_s30 = sshll.u32 %s188_s28, 4  ;;  %s709_s30 = int_to_ptr.vmem [resolvable:$true] %s351_s30 }
  0x1b   : > { %228 = vperm.xlu1 %513, %v210_v6   ;;  %218 = vperm.xlu0 %512, %v208_v7   ;;  %s519_s7 = scalar_lea.vmem %s709_s30, 1024  ;;  %p526_p1 = scmp.lt.s32.totalorder %s709_s30, %s524_s9 }
  0x1c   : > { %280 = vmatprep.subr.bf16.mxu0 %v264_v10  ;;  %451 = vmatprep.subr.bf16.mxu1 %v264_v10  ;;  %p520_p12 = scmp.ne.s32.totalorder %s709_s30, %s519_s7  ;;  %p527_p2 = scmp.lt.s32.totalorder %s525_s10, %s519_s7 }
  0x1d   : > { %281 = vmatpush1.bf16.msra.mxu0 %v261_v11  ;;  %452 = vmatpush1.bf16.msra.mxu1 %v261_v11 }
  0x1e   : > { %p521_p13 = pnand %p520_p12, %p662_p4  ;;  %p528_p3 = por %p527_p2, %p526_p1 }
  0x20   : > { %442 = vmatmul.mubr.msk.bf16.vlgmr.msra.gmra.mxu0 %vm249_vm2, %v517_v12  ;;  %443 = vmatmul.mubr.msk.bf16.vlgmr.msra.gmra.mxu1 %vm249_vm2, %v518_v13  ;;  %p522_p0 = pneg %p521_p13 }
  0x22   : > { %p529_p5 = pnand %p528_p3, %p522_p0 }
  0x92   : > { %v224_v14 = vpop.permute.xlu1 %223  ;;  %v214_v15 = vpop.permute.xlu0 %213 }
  0x96   : > { %v229_v24 = vpop.permute.xlu1 %228  ;;  %v219_v25 = vpop.permute.xlu0 %218 }
  0xe0   : > { %v300_v16 = vpop.f32.mrf.mxu0  ;;  %v310_v17 = vpop.f32.mrf.mxu1 }
  0xe1   : > { %v301_v18 = vadd.f32 %v300_v16, %v214_v15  ;;  %v311_v19 = vadd.f32 %v310_v17, %v224_v14 }
  0xe2   : > { %v302_v20 = vpop.f32.mrf.mxu0  ;;  %v312_v21 = vpop.f32.mrf.mxu1 }
  0xe3   : > { %v319_v22 = vmax.f32 %v301_v18, 0.0  ;;  %v323_v23 = vmax.f32 %v311_v19, 0.0  ;;  %v303_v26 = vadd.f32 %v302_v20, %v214_v15  ;;  %v313_v27 = vadd.f32 %v312_v21, %v224_v14 }
  0xe4   : > { %v304_v28 = vpop.f32.mrf.mxu0  ;;  %v314_v29 = vpop.f32.mrf.mxu1 }
  0xe5   : > { %327 = vst [vmem:[%s188_s28] sm:$0xff] %v319_v22  ;;  %331 = vst [vmem:[%s188_s28 + $0x20] sm:$0xff] %v323_v23  ;;  %v320_v30 = vmax.f32 %v303_v26, 0.0  ;;  %v324_v31 = vmax.f32 %v313_v27, 0.0  ;;  %v305_v32 = vadd.f32 %v304_v28, %v219_v25  ;;  %v315_v33 = vadd.f32 %v314_v29, %v229_v24 }
  0xe6   : > { %v306_v34 = vpop.f32.mrf.mxu0  ;;  %v316_v35 = vpop.f32.mrf.mxu1 }
  0xe7   : > { %328 = vst [vmem:[%s188_s28 + $0x8] sm:$0xff] %v320_v30  ;;  %332 = vst [vmem:[%s188_s28 + $0x28] sm:$0xff] %v324_v31  ;;  %v321_v36 = vmax.f32 %v305_v32, 0.0  ;;  %v325_v37 = vmax.f32 %v315_v33, 0.0  ;;  %v307_v38 = vadd.f32 %v306_v34, %v219_v25  ;;  %v317_v39 = vadd.f32 %v316_v35, %v229_v24 }
  0xe9   : > { %329 = vst [vmem:[%s188_s28 + $0x10] sm:$0xff] %v321_v36  ;;  %333 = vst [vmem:[%s188_s28 + $0x30] sm:$0xff] %v325_v37  ;;  %v322_v40 = vmax.f32 %v307_v38, 0.0  ;;  %v326_v41 = vmax.f32 %v317_v39, 0.0 }
  0xeb   : > { %330 = vst [vmem:[%s188_s28 + $0x18] sm:$0xff] %v322_v40  ;;  %334 = vst [vmem:[%s188_s28 + $0x38] sm:$0xff] %v326_v41 }
  0xec   : > { %532 = shalt.err (!%p529_p5)
}
  0xed   : > { %s533_s11 = scalar_lea.hbm %s707_s6, 1024  ;;  %s537_s21 = scalar_lea.hbm %s761_s3, 2048 }
  0xee   : > { %p534_p6 = scmp.ne.s32.totalorder %s707_s6, %s533_s11  ;;  %p538_p10 = scmp.lt.s32.totalorder %s707_s6, %s761_s3 }
  0xef   : > { %p539_p11 = scmp.lt.s32.totalorder %s537_s21, %s533_s11 }
  0xf0   : > { %p535_p7 = pnand %p534_p6, %p662_p4 }
  0xf1   : > { %p540_p12 = por %p539_p11, %p538_p10 }
  0xf2   : > { %p536_p9 = pneg %p535_p7 }
  0xf4   : > { %p541_p13 = pnand %p540_p12, %p536_p9 }
  0xf6   : > { %544 = shalt.err (!%p541_p13)
}
  0xf7   : > { %s600_s27 = smov 256   ;;  %s601_s28 = smov 16  }
  0xf8   : > { %453 = dma.vmem_to_hbm [thread:$0]  (%p662_p4), %s709_s30, 1024, %s707_s6, %s713_s15, %s600_s27, %s600_s27, %s601_s28  }
  0xf9 PF: > { %p459_p0 = scmp.ge.s32.totalorder %s595_s17, 2  ;;  %s366_s29 = sand.u32 1, %s575_s12  }
  0xfa   : > { %s367_s4 = scalar_lea.sflag [#allocation3], %s366_s29 }
  0xfb   : > { %p456_p1 = pnand %p459_p0, %p669_p8 }
  0xfd   : > { %p457_p2 = pneg %p456_p1 }
  0xff   : > { %570 = dma.done.wait (%p457_p2), %s367_s4, 1024  }
 0x100   : > { %572 = vsyncadd (%p457_p2), %s367_s4, 4294966272  ;;  %s16_s17 = sadd.s32 1, %s595_s17   ;;  %s764_s12 = smov %s579_s13 }
 0x101   : > { %p13_p3 = scmp.ge.s32.totalorder %s16_s17, 4   ;;  %s765_s13 = smov %s583_s14 }
 0x102   : > { %s766_s14 = smov %s675_s25  ;;  %s767_s15 = smov %s591_s16 }
 0x103   : > { %s768_s16 = smov %s770_s20  ;;  %15 = sbr.rel (!%p13_p3) target bundleno = 4 (0x4), region = 67 }
 0x108   :  { %372 = vsyncpa [#allocation3], 1 }
 0x109   :  { %374 = vsyncpa [#allocation3 + $0x1], 1 }

</bundles_post_ra>
